<compile_context>
chip_gen: v5e
topology: v5e:2x2
jax: 0.10.0
libtpu: 0.0.40
codegen_flags: <defaults>
</compile_context>

<pallas_src>
import numpy as np
import jax
import jax.numpy as jnp
from jax.experimental import pallas as pl
from jax.experimental.pallas import tpu as pltpu


# ----------------------------------------------------------------------------
# quaternion -> rotation / 4x4 transform (row-vector convention: p_out = [x y z 1] @ M)
# quaternion layout: (w, x, y, z). Works with xp = numpy (init) or jnp (forward).
# ----------------------------------------------------------------------------
def quaternion_rotation(quaternion, xp):
    w, x, y, z = (quaternion[:, 0], quaternion[:, 1],
                  quaternion[:, 2], quaternion[:, 3])
    R = xp.stack([
        xp.stack([1 - 2 * (y * y + z * z), 2 * (x * y - z * w), 2 * (x * z + y * w)], axis=-1),
        xp.stack([2 * (x * y + z * w), 1 - 2 * (x * x + z * z), 2 * (y * z - x * w)], axis=-1),
        xp.stack([2 * (x * z - y * w), 2 * (y * z + x * w), 1 - 2 * (x * x + y * y)], axis=-1),
    ], axis=-2)                                    # (N, 3, 3) column-vector convention
    return xp.swapaxes(R, -1, -2)                  # row-vector convention uses R^T


def quaternion_to_mat4(quaternion, translation, xp, scale=None):
    RT = quaternion_rotation(quaternion, xp)       # (N,3,3)
    n = quaternion.shape[0]
    t3 = translation[:, :3]

    def assemble(top):                             # top: (N,3,3) row-vector rotation block
        zeros_col = xp.zeros((n, 3, 1), dtype=top.dtype)
        upper = xp.concatenate([top, zeros_col], axis=2)             # (N,3,4)
        ones = xp.ones((n, 1, 1), dtype=top.dtype)
        bottom = xp.concatenate([t3[:, None, :].astype(top.dtype), ones], axis=2)
        return xp.concatenate([upper, bottom], axis=1)               # (N,4,4)

    mat = assemble(RT)
    if scale is None:
        return mat
    RT_scaled = scale[:, :, None] * RT             # p @ (S R^T)  ==  R S p  (+ t)
    return mat, assemble(RT_scaled)


# ----------------------------------------------------------------------------
# Pallas kernel: transposed lane-dense skinning
#   out3^T (3, V_pad) = m3_T (3, 4B) @ vbi_T (4B, V_pad), tiled over vertex lanes.
# ----------------------------------------------------------------------------
def _skin_kernel(t_ref, vbi_ref, out_ref):
    out_ref[...] = jnp.dot(t_ref[...], vbi_ref[...],
                           preferred_element_type=jnp.float32)


def _round_up(x, m):
    return ((x + m - 1) // m) * m


def _choose_vertex_tile(num_vertices):
    # Lane-dense tiles (multiples of 128), big enough to stay out of the
    # per-grid-step overhead regime; a (4B, 2048) f32 tile is only ~256 KiB
    # for B=8, so double-buffering is trivial on v5e/v6e/v7x VMEM.
    v_pad = _round_up(max(num_vertices, 512), 512)
    for tv in (2048, 1024, 512):
        if v_pad % tv == 0:
            return tv, v_pad
    return 512, v_pad  # unreachable (v_pad is a multiple of 512)


def skin_vertices_T(m3_T, vbi_T, tv):
    three, K = m3_T.shape
    K2, v_pad = vbi_T.shape
    assert three == 3 and K == K2 and v_pad % tv == 0
    return pl.pallas_call(
        _skin_kernel,
        out_shape=jax.ShapeDtypeStruct((3, v_pad), jnp.float32),
        grid_spec=pltpu.PrefetchScalarGridSpec(
            num_scalar_prefetch=0,
            grid=(v_pad // tv,),
            in_specs=[
                # tiny transform block; constant index_map -> fetched once, stays resident
                pl.BlockSpec((3, K), lambda i: (0, 0)),
                # large VBI^T operand: vertices on the lane axis -> dense loads
                pl.BlockSpec((K, tv), lambda i: (0, i)),
            ],
            # lane-dense output (vertices on lanes) -> unmasked stores
            out_specs=pl.BlockSpec((3, tv), lambda i: (0, i)),
        ),
        compiler_params=pltpu.CompilerParams(
            dimension_semantics=("parallel",)),
    )(m3_T, vbi_T)


# ----------------------------------------------------------------------------
# ArmatureLayer in JAX (init precompute in float64 numpy, forward in float32).
# ----------------------------------------------------------------------------
class ArmatureLayerJax:
    def __init__(self, vertices_input, vertex_colors, faces, bone_name_to_index,
                 bone_scale_share_map, bone_parents, bone_quaternions,
                 bone_translations, pose_bone_quaternions, pose_bone_translations,
                 pose_bone_initial_scales, bone_vertex_indices, bone_vertex_weights):
        vertices_input = np.asarray(vertices_input, dtype=np.float64)
        vertex_colors = np.asarray(vertex_colors, dtype=np.float64)
        faces = np.asarray(faces, dtype=np.int64)
        bone_quaternions = np.asarray(bone_quaternions, dtype=np.float64)
        bone_translations = np.asarray(bone_translations, dtype=np.float64)
        bone_parents = np.asarray(bone_parents, dtype=np.int64)
        pose_bone_quaternions = np.asarray(pose_bone_quaternions, dtype=np.float64)
        pose_bone_translations = np.asarray(pose_bone_translations, dtype=np.float64)
        pose_bone_initial_scales = np.asarray(pose_bone_initial_scales, dtype=np.float64)

        B = pose_bone_translations.shape[0]
        V = vertices_input.shape[0]
        self.num_bones = B
        self.num_vertices = V
        self.bone_parents = bone_parents                     # static (host) ints

        bone_matrices_world = quaternion_to_mat4(bone_quaternions, bone_translations, np)
        bone_matrices_world_inv = np.linalg.inv(bone_matrices_world)

        _, pose_bone_matrices_world = quaternion_to_mat4(
            pose_bone_quaternions, pose_bone_translations, np,
            scale=pose_bone_initial_scales)
        pose_bone_matrices_world_inv = np.linalg.inv(pose_bone_matrices_world)

        rel = np.ones((B, 4), dtype=np.float64)
        rel[:, :3] = pose_bone_translations
        for i in range(B):
            p = int(bone_parents[i])
            if p != -1:
                rel[i, :] = rel[i, None, :] @ pose_bone_matrices_world_inv[p]

        vbi = np.zeros((B, V, 4), dtype=np.float64)
        for b in range(B):
            idx = np.asarray(bone_vertex_indices[b], dtype=np.int64)
            w_b = np.asarray(bone_vertex_weights[b], dtype=np.float64)
            ones = np.ones((idx.shape[0], 1), dtype=np.float64)
            bone_verts4 = np.concatenate([vertices_input[idx, :], ones], axis=1)
            inverted = (bone_verts4 * w_b[:, None]) @ bone_matrices_world_inv[b]
            vbi[b, idx, :] = inverted
        vertex_total_weight = vbi[:, :, 3].sum(axis=0)
        if np.any(vertex_total_weight == 0.0):
            raise ValueError("ArmatureLayer: some vertices have zero total bone weight")
        vbi = vbi / vertex_total_weight[None, :, None]

        # Static topological levels of the bone hierarchy (parents must precede
        # children in index order for the reference forward to work at all).
        depth = np.zeros((B,), dtype=np.int64)
        for i in range(B):
            p = int(bone_parents[i])
            depth[i] = 0 if p == -1 else depth[p] + 1
        self._levels = []
        for d in range(int(depth.max()) + 1):
            idx = np.nonzero(depth == d)[0].astype(np.int32)
            par = bone_parents[idx].astype(np.int32)
            self._levels.append((idx, par))

        # Lane-dense skinning layout: VBI^T (4B, V_pad), vertices on lanes.
        self._tv, self._v_pad = _choose_vertex_tile(V)
        vbi_T = vbi.transpose(0, 2, 1).reshape(B * 4, V)     # row b*4+c = vbi[b, :, c]
        vbi_T_pad = np.zeros((B * 4, self._v_pad), dtype=np.float64)
        vbi_T_pad[:, :V] = vbi_T

        # buffers / parameters (float32 on device)
        self.vertex_colors = jnp.asarray(vertex_colors, dtype=jnp.float32)
        self.faces = jnp.asarray(faces, dtype=jnp.int32)
        self.pose_bone_initial_scales = jnp.asarray(pose_bone_initial_scales, jnp.float32)
        self.relative_pose_bone_translations = jnp.asarray(rel, jnp.float32)
        self.vertices_bone_inverted = jnp.asarray(vbi, jnp.float32)            # (B,V,4)
        self.vertices_bone_inverted_T = jnp.asarray(vbi_T_pad, jnp.float32)    # (4B,V_pad)
        self.pose_bone_quaternions = jnp.asarray(pose_bone_quaternions, jnp.float32)
        self.offset = jnp.zeros((3,), jnp.float32)
        self.bone_index_to_scale_index = {
            bone_name_to_index[name]: bone_scale_share_map[name]
            for name in bone_name_to_index.keys()}
        num_shared = int(np.max(list(self.bone_index_to_scale_index.values()))) + 1
        self.pose_bone_scales = jnp.ones((num_shared, 3), jnp.float32)
        self.one = jnp.ones((1,), jnp.float32)

        self._forward = jax.jit(self._make_forward())

    def _make_forward(self):
        B = self.num_bones
        V = self.num_vertices
        tv = self._tv
        levels = self._levels

        def fwd(pose_q, offset, rel, vbi_T):
            qn = pose_q / jnp.linalg.norm(pose_q, axis=1, keepdims=True)
            Rt = quaternion_rotation(qn, jnp)                       # (B,3,3) batched

            # Parent-chain translation recurrence, batched per topological level:
            #   t4_i = rel_i @ M_parent  with  M = [[R^T, 0], [t, 1]]
            t3 = jnp.zeros((B, 3), jnp.float32)
            root_idx, _ = levels[0]
            t3 = t3.at[root_idx].set(rel[root_idx, :3] + offset[None, :])
            for idx, par in levels[1:]:
                new_t = (jnp.einsum('bi,bij->bj', rel[idx, :3], Rt[par])
                         + rel[idx, 3:4] * t3[par])
                t3 = t3.at[idx].set(new_t)

            # Assemble all (B,4,4) row-vector transforms [[R^T, 0], [t, 1]] at once.
            zeros_col = jnp.zeros((B, 3, 1), jnp.float32)
            upper = jnp.concatenate([Rt, zeros_col], axis=2)          # (B,3,4)
            ones = jnp.ones((B, 1, 1), jnp.float32)
            bottom = jnp.concatenate([t3[:, None, :], ones], axis=2)  # (B,1,4)
            transforms = jnp.concatenate([upper, bottom], axis=1)     # (B,4,4)
            # NOTE: matching the PyTorch reference exactly, the UNSCALED transform is
            # used for skinning too (pose_bone_scales never affect the output).

            # ----- hot path: lane-dense transposed skinning in Pallas -----
            m3_T = transforms.reshape(B * 4, 4)[:, :3].T              # (3, 4B)
            out3_T = skin_vertices_T(m3_T, vbi_T, tv)                 # (3, V_pad)
            vertices_output = out3_T[:, :V].T                         # (V, 3)
            return vertices_output, transforms

        return fwd

    def __call__(self, combined_image, video_image, green_screen_image, chroma_mask):
        # repackage(...) calls are autograd bookkeeping -> no-ops in JAX.
        vertices_output, pose_bone_transforms = self._forward(
            self.pose_bone_quaternions, self.offset,
            self.relative_pose_bone_translations, self.vertices_bone_inverted_T)
        mesh = (vertices_output[None, :, :].astype(jnp.float32),
                self.faces[None, :, :].astype(jnp.int32),
                self.vertex_colors[None, :, :3].astype(jnp.float32))
        return mesh, pose_bone_transforms, self.pose_bone_scales


# ----------------------------------------------------------------------------
if __name__ == "__main__":
    key = jax.random.PRNGKey(0)
    keys = jax.random.split(key, 10)
    V, B, F, H, W = 512, 8, 64, 16, 16

    def unit_quat(k, n):
        qq = np.asarray(jax.random.normal(k, (n, 4)), dtype=np.float64)
        return qq / np.linalg.norm(qq, axis=1, keepdims=True)

    vertices_input = np.asarray(jax.random.normal(keys[0], (V, 3)), dtype=np.float64)
    vertex_colors = np.asarray(jax.random.uniform(keys[1], (V, 4)), dtype=np.float64)
    faces = np.asarray(jax.random.randint(keys[2], (F, 3), 0, V), dtype=np.int64)
    bone_parents = np.array([-1, 0, 1, 2, 0, 4, 5, 0], dtype=np.int64)
    bone_quaternions = unit_quat(keys[3], B)
    bone_translations = np.asarray(jax.random.normal(keys[4], (B, 3)), dtype=np.float64)
    pose_bone_quaternions = unit_quat(keys[5], B)
    pose_bone_translations = np.asarray(jax.random.normal(keys[6], (B, 3)), dtype=np.float64)
    pose_bone_initial_scales = np.asarray(
        jax.random.uniform(keys[7], (B, 3), minval=0.5, maxval=1.5), dtype=np.float64)
    bone_name_to_index = {f"bone_{i}": i for i in range(B)}
    bone_scale_share_map = {f"bone_{i}": i // 2 for i in range(B)}
    bone_vertex_indices = [np.arange(V, dtype=np.int64) for _ in range(B)]
    w_all = np.asarray(jax.random.uniform(keys[8], (B, V), minval=0.1, maxval=1.0),
                       dtype=np.float64)
    bone_vertex_weights = [w_all[i] for i in range(B)]

    layer = ArmatureLayerJax(
        vertices_input, vertex_colors, faces, bone_name_to_index, bone_scale_share_map,
        bone_parents, bone_quaternions, bone_translations, pose_bone_quaternions,
        pose_bone_translations, pose_bone_initial_scales,
        bone_vertex_indices, bone_vertex_weights)

    # unused image inputs (NCHW, as in the PyTorch signature)
    combined_image = jax.random.uniform(keys[9], (1, 3, H, W), dtype=jnp.float32)
    video_image = combined_image
    green_screen_image = combined_image
    chroma_mask = jnp.ones((1, 1, H, W), jnp.float32)

    (mesh_verts, mesh_faces, mesh_tex), pose_bone_transforms, pose_bone_scales = layer(
        combined_image, video_image, green_screen_image, chroma_mask)
    jax.block_until_ready((mesh_verts, mesh_faces, mesh_tex,
                           pose_bone_transforms, pose_bone_scales))

    # pure-JAX reference of the Pallas skinning reduction
    ref = jnp.matmul(layer.vertices_bone_inverted, pose_bone_transforms).sum(axis=0)[:, :3]
    np.testing.assert_allclose(np.asarray(mesh_verts[0]), np.asarray(ref),
                               rtol=1e-4, atol=1e-4)
    print("KERNEL_OK")
</pallas_src>

<mosaic_0001>
module attributes {stable_mosaic.version = 11 : i64} {
  func.func @_skin_kernel(%arg0: i32, %arg1: memref<3x32xf32, #tpu.memory_space<vmem>>, %arg2: memref<32x512xf32, #tpu.memory_space<vmem>>, %arg3: memref<3x512xf32, #tpu.memory_space<vmem>>) attributes {dimension_semantics = [#tpu.dimension_semantics<parallel>], iteration_bounds = array<i64: 1>, scalar_prefetch = 0 : i64, scratch_operands = 0 : i64, tpu.core_type = #tpu.core_type<tc>, window_params = [{pipeline_mode = #tpu.pipeline_mode<synchronous>, transform_indices = @transform_0, window_bounds = array<i64: 3, 32>}, {transform_indices = @transform_1, window_bounds = array<i64: 32, 512>}, {transform_indices = @transform_2, window_bounds = array<i64: 3, 512>}]} {
    %c0 = arith.constant 0 : index
    %c0_0 = arith.constant 0 : index
    %0 = vector.load %arg1[%c0, %c0_0] : memref<3x32xf32, #tpu.memory_space<vmem>>, vector<3x32xf32>
    %c0_1 = arith.constant 0 : index
    %c0_2 = arith.constant 0 : index
    %1 = vector.load %arg2[%c0_1, %c0_2] : memref<32x512xf32, #tpu.memory_space<vmem>>, vector<32x512xf32>
    %cst = arith.constant dense<0.000000e+00> : vector<3x512xf32>
    %2 = tpu.matmul %0, %1, %cst {dimension_numbers = #tpu.dot_dimension_numbers<[1], [0], [0], [1], [0, 0, 1, 1], [], []>} : vector<3x32xf32>, vector<32x512xf32>, vector<3x512xf32> -> vector<3x512xf32>
    %c0_3 = arith.constant 0 : index
    %c0_4 = arith.constant 0 : index
    %3 = vector.load %arg3[%c0_3, %c0_4] : memref<3x512xf32, #tpu.memory_space<vmem>>, vector<3x512xf32>
    tpu.vector_store %arg3[%c0_3, %c0_4], %2 {strides = array<i32>} : memref<3x512xf32, #tpu.memory_space<vmem>>, vector<3x512xf32>,
    return
  }
  func.func @transform_0(%arg0: i32) -> (i32, i32) {
    %c0_i32 = arith.constant 0 : i32
    %c0_i32_0 = arith.constant 0 : i32
    %c0_i32_1 = arith.constant 0 : i32
    return %c0_i32, %c0_i32_0 : i32, i32
  }
  func.func @transform_1(%arg0: i32) -> (i32, i32) {
    %c0_i32 = arith.constant 0 : i32
    %c0_i32_0 = arith.constant 0 : i32
    return %c0_i32, %arg0 : i32, i32
  }
  func.func @transform_2(%arg0: i32) -> (i32, i32) {
    %c0_i32 = arith.constant 0 : i32
    %c0_i32_0 = arith.constant 0 : i32
    return %c0_i32, %arg0 : i32, i32
  }
}

</mosaic_0001>

<bundles_post_ra>
// kernel: fwd.1
= control target key start
LH: loop header
LB: loop body
LE: loop exit
PB: predicated region body
PF: predicated region fallthrough
CT: control target
= control target key end

     0   :  { %vm29_vm0 = vcmask 261120   ;;  %s243_s0 = inlined_call_operand.vmem [shape: f32[3,32], index: 0, kind: input, shape index: {}]   ;;  %s244_s1 = inlined_call_operand.vmem [shape: f32[32,512], index: 1, kind: input, shape index: {}]   ;;  %s245_s2 = inlined_call_operand.hbm [shape: f32[3,512], index: 2, kind: output, shape index: {}]  }
   0x1   :  { %v28_v0 = vld [vmem:[%s244_s1 + $0x78] sm:$0xff]  ;;  %v27_v1 = vld [vmem:[%s244_s1 + $0x70] sm:$0xff]  ;;  %v26_v4 = vld [vmem:[%s244_s1 + $0x68] sm:$0xff] }
   0x2   :  { %v24_v2 = vld [vmem:[%s244_s1 + $0x58] sm:$0xff]  ;;  %105 = vmatpush.msra.mxu3 %v28_v0  ;;  %85 = vmatpush.msra.mxu2 %v27_v1  ;;  %v23_v3 = vld [vmem:[%s244_s1 + $0x50] sm:$0xff]  ;;  %v25_v8 = vld [vmem:[%s244_s1 + $0x60] sm:$0xff] }
   0x3   :  { %v20_v5 = vld [vmem:[%s244_s1 + $0x38] sm:$0xff]  ;;  %65 = vmatpush.msra.mxu1 %v26_v4  ;;  %v19_v6 = vld [vmem:[%s244_s1 + $0x30] sm:$0xff]  ;;  %v22_v9 = vld [vmem:[%s244_s1 + $0x48] sm:$0xff]  ;;  %45 = vmatpush.msra.mxu0 %v25_v8 }
   0x4   :  { %106 = vmatpush.msra.mxu3 %v24_v2  ;;  %86 = vmatpush.msra.mxu2 %v23_v3  ;;  %v16_v7 = vld [vmem:[%s244_s1 + $0x18] sm:$0xff]  ;;  %v15_v10 = vld [vmem:[%s244_s1 + $0x10] sm:$0xff]  ;;  %v21_v11 = vld [vmem:[%s244_s1 + $0x40] sm:$0xff] }
   0x5   :  { %66 = vmatpush.msra.mxu1 %v22_v9  ;;  %v18_v12 = vld [vmem:[%s244_s1 + $0x28] sm:$0xff]  ;;  %v12_v13 = vld [vmem:[%s243_s0] sm:$0x7] }
   0x6   :  { %107 = vmatpush.msra.mxu3 %v20_v5  ;;  %87 = vmatpush.msra.mxu2 %v19_v6 }
   0x7   :  { %7 = vsyncpa [#allocation3], 0  ;;  %46 = vmatpush.msra.mxu0 %v21_v11  ;;  %67 = vmatpush.msra.mxu1 %v18_v12  ;;  %v17_v14 = vld [vmem:[%s244_s1 + $0x20] sm:$0xff]  ;;  %v14_v15 = vld [vmem:[%s244_s1 + $0x8] sm:$0xff]  ;;  %vm119_vm1 = vcmask 1043456   ;;  %s173_s0 = smov [#allocation2]  }
   0x8   :  { %108 = vmatpush.msra.mxu3 %v16_v7  ;;  %88 = vmatpush.msra.mxu2 %v15_v10  ;;  %v13_v16 = vld [vmem:[%s244_s1] sm:$0xff]  ;;  %s131_s15 = sshll.u32 %s173_s0, 4  ;;  %s133_s18 = sshll.u32 %s245_s2, 4  ;;  %s132_s15 = int_to_ptr.vmem [resolvable:$true] %s131_s15  ;;  %s134_s18 = int_to_ptr.hbm [resolvable:$true] %s133_s18 }
   0x9   :  { %145 = vmatmul.msk.f32.vlgmr.msra.gmra.mxu3 %vm29_vm0, %v12_v13  ;;  %144 = vmatmul.msk.f32.vlgmr.msra.gmra.mxu2 %vm29_vm0, %v12_v13 }
   0xa   :  { %47 = vmatpush.msra.mxu0 %v17_v14  ;;  %68 = vmatpush.msra.mxu1 %v14_v15 }
   0xb   :  { %143 = vmatmul.msk.f32.vlgmr.msra.gmra.mxu1 %vm29_vm0, %v12_v13 }
   0xc   :  { %48 = vmatpush.msra.mxu0 %v13_v16 }
   0xd   :  { %142 = vmatmul.msk.f32.vlgmr.msra.gmra.mxu0 %vm29_vm0, %v12_v13 }
  0x88   :  { %v70_v17 = vpop.f32.mrf.mxu1 }
  0x89   :  { %v117_v18 = vrot.slane %v70_v17, 4 }
  0x8a   :  { %v50_v19 = vpop.f32.mrf.mxu0 }
  0x8b   :  { %v120_v20 = vsel %vm119_vm1, %v50_v19, %v117_v18 }
  0x8c   :  { %v110_v21 = vpop.f32.mrf.mxu3  ;;  %124 = vst [vmem:[#allocation2] sm:$0x77] %v120_v20  ;;  %v90_v22 = vpop.f32.mrf.mxu2 }
  0x8d   :  { %v118_v23 = vrot.slane %v110_v21, 4 }
  0x8f   :  { %v121_v24 = vsel %vm119_vm1, %v90_v22, %v118_v23 }
  0x90   :  { %125 = vst [vmem:[#allocation2 + $0x8] sm:$0x77] %v121_v24 }
  0x91   :  { %136 = dma.vmem_to_hbm [thread:$0]  %s132_s15, 256, %s134_s18, [#allocation3]  }
  0x92   :  { %171 = dma.done.wait [#allocation3], 256  }
  0x93   :  { %172 = vsyncadd [#allocation3], 4294967040 }
  0x94   :  { %141 = vsyncpa [#allocation3], 1 }

</bundles_post_ra>
